<compile_context>
chip_gen: v5e
topology: v5e:2x2
jax: 0.10.0
libtpu: 0.0.40
codegen_flags: <defaults>
</compile_context>

<pallas_src>
import math

import jax
import jax.numpy as jnp
from jax.experimental import pallas as pl
from jax.experimental.pallas import tpu as pltpu

_NEG_LARGE = -1e30  # effectively -inf for softmax masking, avoids inf arithmetic
_LANE = 128
_SUBLANE = 8
# Use the single-block (no grid) path while (state + padded probs) stays under this.
_SINGLE_BLOCK_ACT_BYTES = 8 * 1024 * 1024
_DEFAULT_GRID_BLOCK_B = 2048


def _round_up(x, m):
    return ((x + m - 1) // m) * m


def policy_net_kernel(x_ref, w1_ref, b1_ref, w2_ref, b2_ref, out_ref):
    # fc1 + ReLU.  bf16 operands -> native MXU path; f32 accumulation.
    # Padded hidden lanes have w=0, b=0 -> relu(0)=0, no effect downstream.
    x = x_ref[...].astype(jnp.bfloat16)
    h = jnp.dot(x, w1_ref[...], preferred_element_type=jnp.float32) + b1_ref[...]
    h = jnp.maximum(h, 0.0)
    # fc2.  Padded action lanes carry bias -1e30 -> exp underflows to exactly 0.
    logits = jnp.dot(h.astype(jnp.bfloat16), w2_ref[...],
                     preferred_element_type=jnp.float32) + b2_ref[...]
    # Softmax over the lane-dense padded action axis; EXACT divide so each row
    # sums to 1 to f32 rounding (approx reciprocal previously broke this).
    m = jnp.max(logits, axis=-1, keepdims=True)
    e = jnp.exp(logits - m)
    denom = jnp.sum(e, axis=-1, keepdims=True)
    out_ref[...] = (e / denom).astype(out_ref.dtype)


def pad_params(w1, b1, w2, b2):
    """One-time prep: zero-pad hidden/action dims to 128-lane multiples.

    Weights are stored as bf16 (halves weight DMA / VMEM); biases stay f32.
    Padded action columns get a -1e30 bias so softmax over the padded axis is
    identical to softmax over the true action_dim (padded probs are exactly 0).
    """
    S, H = w1.shape
    A = w2.shape[1]
    Hp = _round_up(H, _LANE)
    Ap = _round_up(A, _LANE)
    w1p = jnp.zeros((S, Hp), jnp.float32).at[:, :H].set(w1).astype(jnp.bfloat16)
    b1p = jnp.zeros((1, Hp), jnp.float32).at[:, :H].set(jnp.reshape(b1, (1, H)))
    w2p = jnp.zeros((Hp, Ap), jnp.float32).at[:H, :A].set(w2).astype(jnp.bfloat16)
    b2p = jnp.full((1, Ap), _NEG_LARGE, jnp.float32).at[:, :A].set(jnp.reshape(b2, (1, A)))
    return (w1p, b1p, w2p, b2p)


def policy_net_forward(state, padded_params, action_dim, *, block_b=None,
                       return_padded=False):
    """state: (B, state_dim) f32 -> softmax probs (B, action_dim) f32.

    block_b=None : auto.  Single block (no grid) unless the batch is huge, in
                   which case a grid over the batch with 2048 rows/step is used.
    block_b=TB   : force the grid path with TB rows per step (rounded to a
                   multiple of 8; ragged batches are zero-padded and sliced).
    """
    B, S = state.shape
    w1p, b1p, w2p, b2p = padded_params
    Hp = w1p.shape[1]
    Ap = w2p.shape[1]

    act_bytes = B * (S + Ap) * 4
    use_grid = block_b is not None and block_b < B
    if block_b is None and act_bytes > _SINGLE_BLOCK_ACT_BYTES:
        use_grid = True
        block_b = _DEFAULT_GRID_BLOCK_B

    if not use_grid:
        # Single block: no grid, no pipeline machinery -> minimal launch overhead.
        probs_padded = pl.pallas_call(
            policy_net_kernel,
            out_shape=jax.ShapeDtypeStruct((B, Ap), jnp.float32),
            in_specs=[pl.BlockSpec(memory_space=pltpu.MemorySpace.VMEM)] * 5,
            out_specs=pl.BlockSpec(memory_space=pltpu.MemorySpace.VMEM),
        )(state, w1p, b1p, w2p, b2p)
    else:
        block_b = max(_SUBLANE, _round_up(block_b, _SUBLANE))
        Bp = _round_up(B, block_b)
        x = state
        if Bp != B:  # ragged tail: zero-pad the batch, slice back afterwards
            x = jnp.zeros((Bp, S), state.dtype).at[:B].set(state)
        n_steps = Bp // block_b

        # Scoped-VMEM headroom only matters for very large block_b on v5e
        # (16 MiB default); v6e/v7x have plenty at any sane block size.
        weight_bytes = w1p.size * 2 + w2p.size * 2 + (b1p.size + b2p.size) * 4
        per_step_bytes = 2 * block_b * (S + Ap) * 4 + weight_bytes  # double-buffered x/out
        cp_kwargs = dict(dimension_semantics=("parallel",))  # v7x: batch split across TCs
        if per_step_bytes > 12 * 1024 * 1024:
            cp_kwargs["vmem_limit_bytes"] = min(int(per_step_bytes * 2), 100 * 1024 * 1024)

        probs_padded = pl.pallas_call(
            policy_net_kernel,
            out_shape=jax.ShapeDtypeStruct((Bp, Ap), jnp.float32),
            grid=(n_steps,),
            in_specs=[
                pl.BlockSpec((block_b, S), lambda i: (i, 0)),
                pl.BlockSpec((S, Hp), lambda i: (0, 0)),   # weights resident across steps
                pl.BlockSpec((1, Hp), lambda i: (0, 0)),
                pl.BlockSpec((Hp, Ap), lambda i: (0, 0)),
                pl.BlockSpec((1, Ap), lambda i: (0, 0)),
            ],
            out_specs=pl.BlockSpec((block_b, Ap), lambda i: (i, 0)),
            compiler_params=pltpu.CompilerParams(**cp_kwargs),
        )(x, w1p, b1p, w2p, b2p)
        if Bp != B:
            probs_padded = probs_padded[:B]

    if return_padded:
        # Padded action lanes hold exact zeros; consuming this directly avoids
        # the extra XLA copy launched by the column slice below.
        return probs_padded
    # TODO(synk): fuse the consumer (argmax / categorical sampling via pltpu.prng_*)
    # into the kernel so only a (B, 1) action needs to be written back.
    return probs_padded[:, :action_dim]


def init_params(key, state_dim, hidden_dim, action_dim):
    """Deterministic init matching nn.Linear defaults: U(-1/sqrt(fan_in), +1/sqrt(fan_in))."""
    k1, k2, k3, k4 = jax.random.split(key, 4)
    bound1 = 1.0 / math.sqrt(state_dim)
    bound2 = 1.0 / math.sqrt(hidden_dim)
    w1 = jax.random.uniform(k1, (state_dim, hidden_dim), jnp.float32, -bound1, bound1)
    b1 = jax.random.uniform(k2, (1, hidden_dim), jnp.float32, -bound1, bound1)
    w2 = jax.random.uniform(k3, (hidden_dim, action_dim), jnp.float32, -bound2, bound2)
    b2 = jax.random.uniform(k4, (1, action_dim), jnp.float32, -bound2, bound2)
    return w1, b1, w2, b2


if __name__ == "__main__":
    state_dim, hidden_dim, action_dim = 16, 32, 8

    key = jax.random.PRNGKey(0)
    k_params, k_small, k_med, k_grid = jax.random.split(key, 4)
    w1, b1, w2, b2 = init_params(k_params, state_dim, hidden_dim, action_dim)
    padded = pad_params(w1, b1, w2, b2)

    def ref_forward_f32(x):
        # PyTorch-spec math, full f32.
        h = jnp.maximum(x @ w1 + b1, 0.0)
        return jax.nn.softmax(h @ w2 + b2, axis=1)

    def ref_forward_mixed(x):
        # Mirrors the kernel's precision policy: bf16 matmul operands, f32 accumulation.
        xb = x.astype(jnp.bfloat16)
        h = jnp.maximum(
            jnp.dot(xb, w1.astype(jnp.bfloat16), preferred_element_type=jnp.float32) + b1, 0.0)
        logits = jnp.dot(h.astype(jnp.bfloat16), w2.astype(jnp.bfloat16),
                         preferred_element_type=jnp.float32) + b2
        return jax.nn.softmax(logits, axis=1)

    def check(probs, x):
        ref_exact = ref_forward_f32(x)
        ref_mixed = ref_forward_mixed(x)
        assert probs.shape == ref_exact.shape
        # Tight against the like-precision reference, loose against the f32 spec
        # (difference is only bf16 rounding of the matmul operands).
        assert jnp.allclose(probs, ref_mixed, atol=1e-4, rtol=1e-4)
        assert jnp.allclose(probs, ref_exact, atol=2e-2, rtol=2e-2)
        # Exact divide in the kernel -> rows sum to 1 to f32 rounding.
        assert jnp.allclose(jnp.sum(probs, axis=1), 1.0, atol=1e-4)

    # --- tiny batch (per-env-step inference): single block, no grid ---
    x_small = jax.random.normal(k_small, (8, state_dim), jnp.float32)
    probs_small = jax.block_until_ready(policy_net_forward(x_small, padded, action_dim))
    check(probs_small, x_small)

    # --- medium batch: auto path still uses a single block (no grid overhead) ---
    x_med = jax.random.normal(k_med, (256, state_dim), jnp.float32)
    probs_med = jax.block_until_ready(policy_net_forward(x_med, padded, action_dim))
    check(probs_med, x_med)

    # --- forced grid path (large-rollout code path), ragged batch handled ---
    x_grid = jax.random.normal(k_grid, (300, state_dim), jnp.float32)
    probs_grid = jax.block_until_ready(
        policy_net_forward(x_grid, padded, action_dim, block_b=128))
    check(probs_grid, x_grid)

    print("KERNEL_OK")
</pallas_src>

<mosaic_0001>
module attributes {stable_mosaic.version = 11 : i64} {
  func.func @policy_net_kernel(%arg0: memref<8x16xf32, #tpu.memory_space<vmem>>, %arg1: memref<16x128xbf16, #tpu.memory_space<vmem>>, %arg2: memref<1x128xf32, #tpu.memory_space<vmem>>, %arg3: memref<128x128xbf16, #tpu.memory_space<vmem>>, %arg4: memref<1x128xf32, #tpu.memory_space<vmem>>, %arg5: memref<8x128xf32, #tpu.memory_space<vmem>>) attributes {dimension_semantics = [], scalar_prefetch = 0 : i64, scratch_operands = 0 : i64, tpu.core_type = #tpu.core_type<tc>} {
    %c0 = arith.constant 0 : index
    %c0_0 = arith.constant 0 : index
    %0 = vector.load %arg0[%c0, %c0_0] : memref<8x16xf32, #tpu.memory_space<vmem>>, vector<8x16xf32>
    %1 = arith.truncf %0 : vector<8x16xf32> to vector<8x16xbf16>
    %c0_1 = arith.constant 0 : index
    %c0_2 = arith.constant 0 : index
    %2 = vector.load %arg1[%c0_1, %c0_2] : memref<16x128xbf16, #tpu.memory_space<vmem>>, vector<16x128xbf16>
    %cst = arith.constant dense<0.000000e+00> : vector<8x128xf32>
    %3 = tpu.matmul %1, %2, %cst {dimension_numbers = #tpu.dot_dimension_numbers<[1], [0], [0], [1], [0, 0, 1, 1], [], []>} : vector<8x16xbf16>, vector<16x128xbf16>, vector<8x128xf32> -> vector<8x128xf32>
    %c0_3 = arith.constant 0 : index
    %c0_4 = arith.constant 0 : index
    %4 = vector.load %arg2[%c0_3, %c0_4] : memref<1x128xf32, #tpu.memory_space<vmem>>, vector<1x128xf32>
    %5 = vector.broadcast %4 : vector<1x128xf32> to vector<8x128xf32>
    %6 = arith.addf %3, %5 : vector<8x128xf32>
    %cst_5 = arith.constant 0.000000e+00 : f32
    %7 = vector.broadcast %cst_5 : f32 to vector<8x128xf32>
    %8 = arith.maximumf %6, %7 : vector<8x128xf32>
    %9 = arith.truncf %8 : vector<8x128xf32> to vector<8x128xbf16>
    %c0_6 = arith.constant 0 : index
    %c0_7 = arith.constant 0 : index
    %10 = vector.load %arg3[%c0_6, %c0_7] : memref<128x128xbf16, #tpu.memory_space<vmem>>, vector<128x128xbf16>
    %cst_8 = arith.constant dense<0.000000e+00> : vector<8x128xf32>
    %11 = tpu.matmul %9, %10, %cst_8 {dimension_numbers = #tpu.dot_dimension_numbers<[1], [0], [0], [1], [0, 0, 1, 1], [], []>} : vector<8x128xbf16>, vector<128x128xbf16>, vector<8x128xf32> -> vector<8x128xf32>
    %c0_9 = arith.constant 0 : index
    %c0_10 = arith.constant 0 : index
    %12 = vector.load %arg4[%c0_9, %c0_10] : memref<1x128xf32, #tpu.memory_space<vmem>>, vector<1x128xf32>
    %13 = vector.broadcast %12 : vector<1x128xf32> to vector<8x128xf32>
    %14 = arith.addf %11, %13 : vector<8x128xf32>
    %cst_11 = arith.constant dense<0xFF800000> : vector<8xf32>
    %15 = vector.multi_reduction <maximumf>, %14, %cst_11 [1] : vector<8x128xf32> to vector<8xf32>
    %16 = vector.shape_cast %15 : vector<8xf32> to vector<8x1xf32>
    %17 = vector.broadcast %16 : vector<8x1xf32> to vector<8x128xf32>
    %18 = arith.subf %14, %17 : vector<8x128xf32>
    %19 = math.exp %18 : vector<8x128xf32>
    %cst_12 = arith.constant dense<0.000000e+00> : vector<8xf32>
    %20 = vector.multi_reduction <add>, %19, %cst_12 [1] : vector<8x128xf32> to vector<8xf32>
    %21 = vector.shape_cast %20 : vector<8xf32> to vector<8x1xf32>
    %22 = vector.broadcast %21 : vector<8x1xf32> to vector<8x128xf32>
    %23 = arith.divf %19, %22 : vector<8x128xf32>
    %c0_13 = arith.constant 0 : index
    %c0_14 = arith.constant 0 : index
    %24 = vector.load %arg5[%c0_13, %c0_14] : memref<8x128xf32, #tpu.memory_space<vmem>>, vector<8x128xf32>
    tpu.vector_store %arg5[%c0_13, %c0_14], %23 {strides = array<i32>} : memref<8x128xf32, #tpu.memory_space<vmem>>, vector<8x128xf32>,
    return
  }
}

</mosaic_0001>

<bundles_post_ra>
// kernel: tpu_custom_call.1
= control target key start
LH: loop header
LB: loop body
LE: loop exit
PB: predicated region body
PF: predicated region fallthrough
CT: control target
= control target key end

     0   :  { %10 = vsyncpa [#allocation3], 0  ;;  %s436_s0 = inlined_call_operand.hbm [shape: f32[8,16], index: 0, kind: input, shape index: {}]   ;;  %s437_s1 = inlined_call_operand.hbm [shape: bf16[16,128], index: 1, kind: input, shape index: {}]   ;;  %s438_s2 = inlined_call_operand.vmem [shape: f32[1,128], index: 2, kind: input, shape index: {}]   ;;  %s439_s3 = inlined_call_operand.hbm [shape: bf16[128,128], index: 3, kind: input, shape index: {}]   ;;  %s440_s4 = inlined_call_operand.vmem [shape: f32[1,128], index: 4, kind: input, shape index: {}]   ;;  %s441_s5 = inlined_call_operand.hbm [shape: f32[8,128], index: 5, kind: output, shape index: {}]  }
   0x1   :  { %11 = vsyncpa [#allocation6], 0  ;;  %s28_s20 = sshll.u32 %s437_s1, 4  ;;  %s29_s20 = int_to_ptr.hbm [resolvable:$true] %s28_s20 }
   0x2   :  { %12 = vsyncpa [#allocation4], 0  ;;  %s382_s21 = smov [#allocation5]   ;;  %s18_s25 = sshll.u32 %s436_s0, 4  ;;  %s19_s25 = int_to_ptr.hbm [resolvable:$true] %s18_s25 }
   0x3   :  { %s30_s22 = sshll.u32 %s382_s21, 4  ;;  %s383_s26 = smov 64   ;;  %s31_s22 = int_to_ptr.vmem [resolvable:$true] %s30_s22 }
   0x4   :  { %s384_s27 = smov 4   ;;  %s385_s28 = smov [#allocation2]  }
   0x5   :  { %36 = dma.hbm_to_vmem [thread:$0]  %s29_s20, 128, %s31_s22, [#allocation6], %s383_s26, %s383_s26, %s384_s27  }
   0x6   :  { %s20_s29 = sshll.u32 %s385_s28, 4  ;;  %s43_s7 = sshll.u32 %s439_s3, 4  ;;  %s21_s29 = int_to_ptr.vmem [resolvable:$true] %s20_s29  ;;  %s44_s7 = int_to_ptr.hbm [resolvable:$true] %s43_s7 }
   0x7   :  { %23 = dma.hbm_to_vmem [thread:$0]  %s19_s25, 128, %s21_s29, [#allocation3]  }
   0x8   :  { %s386_s1 = smov [#allocation7]  }
   0x9   :  { %s45_s8 = sshll.u32 %s386_s1, 4  ;;  %s46_s8 = int_to_ptr.vmem [resolvable:$true] %s45_s8 }
   0xa   :  { %51 = dma.hbm_to_vmem [thread:$0]  %s44_s7, 1024, %s46_s8, [#allocation6], %s383_s26, %s383_s26, %s384_s27  }
   0xb   :  { %376 = dma.done.wait [#allocation3], 128  }
   0xc   :  { %377 = vsyncadd [#allocation3], 4294967168 }
   0xd   :  { %378 = dma.done.wait [#allocation6], 1152  }
   0xe   :  { %379 = vsyncadd [#allocation6], 4294966144  ;;  %v259_v0 = vld [vmem:[#allocation5] sm:$0xff]  ;;  %v67_v1 = vld [vmem:[#allocation2] sm:$0xff]  ;;  %vm81_vm0 = vcmask 130048   ;;  %s211_s13 = sshll.u32 %s441_s5, 4  ;;  %s212_s13 = int_to_ptr.hbm [resolvable:$true] %s211_s13 }
   0xf   :  { %v267_v2 = vld [vmem:[#allocation7 + $0x38] sm:$0xff]  ;;  %v68_v3 = vpack.c.bf16 %v67_v1, %v67_v1  ;;  %92 = vmatpush.bf16.msra.mxu0 %v259_v0  ;;  %v266_v4 = vld [vmem:[#allocation7 + $0x30] sm:$0xff]  ;;  %v265_v5 = vld [vmem:[#allocation7 + $0x28] sm:$0xff] }
  0x10   :  { %168 = vmatpush.bf16.msra.mxu1 %v267_v2  ;;  %v264_v6 = vld [vmem:[#allocation7 + $0x20] sm:$0xff]  ;;  %v263_v7 = vld [vmem:[#allocation7 + $0x18] sm:$0xff]  ;;  %v262_v8 = vld [vmem:[#allocation7 + $0x10] sm:$0xff] }
  0x11   :  { %v261_v9 = vld [vmem:[#allocation7 + $0x8] sm:$0xff]  ;;  %v260_v10 = vld [vmem:[#allocation7] sm:$0xff]  ;;  %v274_v11 = vld [vmem:[%s438_s2] ss:$0 sm:$0xff]  ;;  %s387_s2 = smov [#allocation8]  }
  0x12   :  { %226 = vmatmul.msk.bf16.vlgmr.msra.gmra.mxu0 %vm81_vm0, %v68_v3  ;;  %v275_v17 = vld [vmem:[%s440_s4] ss:$0 sm:$0xff]  ;;  %s209_s4 = sshll.u32 %s387_s2, 4  ;;  %s210_s4 = int_to_ptr.vmem [resolvable:$true] %s209_s4 }
  0x14   :  { %169 = vmatpush.bf16.msra.mxu1 %v266_v4 }
  0x18   :  { %170 = vmatpush.bf16.msra.mxu1 %v265_v5 }
  0x1c   :  { %171 = vmatpush.bf16.msra.mxu1 %v264_v6 }
  0x20   :  { %172 = vmatpush.bf16.msra.mxu1 %v263_v7 }
  0x24   :  { %173 = vmatpush.bf16.msra.mxu1 %v262_v8 }
  0x28   :  { %174 = vmatpush.bf16.msra.mxu1 %v261_v9 }
  0x2c   :  { %175 = vmatpush.bf16.msra.mxu1 %v260_v10 }
  0x8f   :  { %v94_v12 = vpop.f32.mrf.mxu0 }
  0x90   :  { %v95_v13 = vadd.f32 %v274_v11, %v94_v12 }
  0x92   :  { %v98_v14 = vmax.f32 %v95_v13, 0.0 }
  0x94   :  { %v99_v15 = vpack.c.bf16 %v98_v14, %v98_v14 }
  0x96   :  { %176 = vmatmul.bf16.vlgmr.msra.gmra.mxu1 %v99_v15 }
  0x97   :  { %v96_v16 = vpop.f32.mrf.mxu0 }
 0x113   :  { %v177_v18 = vpop.f32.mrf.mxu1 }
 0x114   :  { %v178_v19 = vadd.f32 %v275_v17, %v177_v18 }
 0x116   :  { %181 = vmax.xlane.f32.xlu0 %v178_v19 }
 0x11b   :  { %v179_v20 = vpop.f32.mrf.mxu1 }
 0x189   :  { %v182_v21 = vpop.xlane.xlu0 %181 }
 0x18a   :  { %v183_v22 = vsub.f32 %v178_v19, %v182_v21 }
 0x18c   :  { %v184_v23 = vmul.f32 1.442695, %v183_v22 }
 0x18e   :  { %276 = vpow2.f32 %v184_v23 }
 0x194   :  { %v277_v24 = vpop.eup %276 }
 0x195   :  { %186 = vadd.xlane.f32.xlu0 %v277_v24 }
 0x208   :  { %v187_v25 = vpop.xlane.xlu0 %186 }
 0x209   :  { %278 = vrcp.f32 %v187_v25  ;;  %v199_v29 = vand.u32 2147483648, %v187_v25  ;;  %v197_v31 = vand.u32 2147483647, %v187_v25  ;;  %vm193_vm2 = vweird.f32 %v187_v25 }
 0x20b   :  { %v200_v33 = vor.u32 1.1754944e-38, %v199_v29  ;;  %vm198_vm4 = vcmp.eq.f32.partialorder %v197_v31, 8.507059e+37 }
 0x20f   :  { %v279_v26 = vpop.eup %278 }
 0x210   :  { %v189_v27 = vmul.f32 %v279_v26, %v187_v25  ;;  %vm194_vm1 = vweird.f32 %v279_v26 }
 0x211   :  { %vm195_vm3 = vmor %vm193_vm2, %vm194_vm1 }
 0x212   :  { %v190_v28 = vsub.f32 1.0, %v189_v27 }
 0x214   :  { %v191_v30 = vmul.f32 %v279_v26, %v190_v28 }
 0x216   :  { %v192_v32 = vadd.f32 %v279_v26, %v191_v30 }
 0x218   :  { %v196_v34 = vsel %vm195_vm3, %v279_v26, %v192_v32 }
 0x219   :  { %v201_v35 = vsel %vm198_vm4, %v200_v33, %v196_v34 }
 0x21a   :  { %v202_v36 = vmul.f32 %v277_v24, %v201_v35 }
 0x21c   :  { %203 = vst [vmem:[#allocation8] sm:$0xff] %v202_v36 }
 0x21d   :  { %214 = dma.vmem_to_hbm [thread:$0]  %s210_s4, 128, %s212_s13, [#allocation4]  }
 0x21e   :  { %380 = dma.done.wait [#allocation4], 128  }
 0x21f   :  { %381 = vsyncadd [#allocation4], 4294967168 }
 0x220   :  { %219 = vsyncpa [#allocation3], 1 }
 0x221   :  { %220 = vsyncpa [#allocation6], 1 }
 0x222   :  { %221 = vsyncpa [#allocation4], 1 }

</bundles_post_ra>
